<compile_context>
chip_gen: v7x
topology: tpu7x:2x2x1
jax: 0.10.0
libtpu: 0.0.40
codegen_flags: <defaults>
</compile_context>

<pallas_src>
import functools

import jax
import jax.numpy as jnp
from jax import lax
from jax.experimental import pallas as pl
from jax.experimental.pallas import tpu as pltpu


def _round_up(a, b):
    return -(-a // b) * b


def _conv1d_kernel(x_ref, h_ref, w_ref, b_ref, o_ref, xs_ref, *,
                   K, C_in, stride, dilation, TL, q_max):
    """One (batch, C_out-tile, L-tile) block.

    x_ref : (1, stride*C_in, TL)      main phase-decomposed input tile
    h_ref : (1, 1, stride*C_in, H)    per-tile halo columns (first q_max used)
    w_ref : (TCO, K*C_in)             im2col weight tile (resident when n_co==1)
    b_ref : (TCO, 1)                  f32 bias
    o_ref : (1, TCO, TL)              NCL output tile (lane axis = L)
    xs_ref: (K*C_in, TL)              VMEM scratch: stacked-tap (im2col) tile
    """
    if K == 1:
        xs = x_ref[0, :C_in, :]
    else:
        # Stack the K taps along the channel (sublane) axis; all offsets static.
        for k in range(K):
            off = k * dilation
            p, q = off % stride, off // stride          # phase / in-phase offset
            dst = slice(k * C_in, (k + 1) * C_in)
            src = slice(p * C_in, (p + 1) * C_in)
            if q == 0:
                xs_ref[dst, :] = x_ref[0, src, :]
            elif q < TL:
                xs_ref[dst, :TL - q] = x_ref[0, src, q:]
                xs_ref[dst, TL - q:] = h_ref[0, 0, src, :q]
            else:  # whole window lives in the halo (huge dilation)
                xs_ref[dst, :] = h_ref[0, 0, src, q - TL:q]
        xs = xs_ref[...]
    # Single K*C_in-deep MXU contraction; f32 accumulate; bias folded in.
    acc = jnp.dot(w_ref[...], xs, preferred_element_type=jnp.float32)
    o_ref[0] = (acc + b_ref[...]).astype(o_ref.dtype)


@functools.partial(jax.jit, static_argnames=("stride", "padding", "dilation",
                                              "groups", "compute_dtype"))
def conv1d_layer_forward(x, weight, bias=None, *, stride=1, padding=0, dilation=1,
                         groups=1, compute_dtype=jnp.bfloat16):
    """Forward pass of Conv1dLayer (same semantics as torch.nn.Conv1d).

    x:      (N, C_in, L)                -- PyTorch NCL layout.
    weight: (C_out, C_in // groups, K)  -- PyTorch Conv1d weight layout.
    bias:   (C_out,) or None.
    Returns (N, C_out, L_out) in NCL layout (dtype = x.dtype).
    """
    # TODO(synk): grouped convolution (groups > 1) not implemented in the kernel.
    assert groups == 1
    N, C_in, L = x.shape
    C_out, C_in_g, K = weight.shape
    assert C_in_g * groups == C_in
    L_out = (L + 2 * padding - dilation * (K - 1) - 1) // stride + 1
    assert L_out > 0

    out_dtype = x.dtype
    cdt = jnp.dtype(compute_dtype)
    in_b = cdt.itemsize
    out_b = jnp.dtype(out_dtype).itemsize

    SC = stride * C_in                 # rows of the phase-decomposed input
    KC = K * C_in                      # im2col contraction depth
    q_max = ((K - 1) * dilation) // stride   # halo columns per tile
    H = max(q_max, 1)

    # ---- C_out tiling (bounds resident weight + f32 accumulator; 256 = MXU dim).
    TCO = C_out if C_out <= 256 else 256
    C_out_p = _round_up(C_out, TCO)
    n_co = C_out_p // TCO

    # ---- L tiling: lane-dense (multiple of 128) tiles sized from a VMEM budget.
    VMEM_BUDGET = 16 * 2 ** 20
    per_col = (3 * SC + KC) * in_b + 2 * TCO * out_b + 4 * TCO
    fixed = 2 * TCO * KC * in_b + 2 * SC * H * in_b + 8 * TCO
    tl_cap = max(128, (VMEM_BUDGET - fixed) // max(per_col, 1))
    tl_cap = max(128, (tl_cap // 128) * 128)
    L_out_128 = _round_up(L_out, 128)
    TL = min(L_out_128, 8192, tl_cap)
    if N * n_co == 1 and TL >= L_out_128 and L_out_128 >= 256:
        # Guarantee >= 2 grid steps so both v7x TensorCores get work.
        TL = _round_up(-(-L_out // 2), 128)
    n_lt = -(-L_out // TL)
    L_out_p = n_lt * TL
    Lph = L_out_p + q_max

    # ---- single fused pass: cast + pad + phase-decompose (pure indexing).
    # Phase p holds x_pad[..., p::stride]; tap k reads phase (k*d)%s at in-phase
    # offset (k*d)//s, so every in-kernel tap slice is static.
    xc = x.astype(cdt)
    pad_r = padding + max(0, Lph * stride - (L + 2 * padding))
    x_pad = jnp.pad(xc, ((0, 0), (0, 0), (padding, pad_r))) if (padding or pad_r) else xc
    if stride == 1:
        x_flat = x_pad                                               # (N, C_in, Lph)
    else:
        phases = [lax.slice(x_pad, (0, 0, p),
                            (N, C_in, p + (Lph - 1) * stride + 1),
                            (1, 1, stride)) for p in range(stride)]
        x_flat = jnp.concatenate(phases, axis=1)                     # (N, SC, Lph)

    # ---- tiny per-tile halo array: halo[n, j] = x_flat[n, :, (j+1)*TL : +q_max].
    if q_max == 0:
        halo = jnp.zeros((N, n_lt, SC, 1), cdt)
    elif q_max <= TL:
        shifted = x_flat[:, :, TL:]
        shifted = jnp.pad(shifted, ((0, 0), (0, 0),
                                    (0, n_lt * TL - shifted.shape[-1])))
        halo = shifted.reshape(N, SC, n_lt, TL)[..., :q_max]
        halo = jnp.transpose(halo, (0, 2, 1, 3))                     # (N, n_lt, SC, H)
    else:
        halo = jnp.stack([x_flat[:, :, (j + 1) * TL:(j + 1) * TL + q_max]
                          for j in range(n_lt)], axis=1)

    # ---- weight in im2col layout (C_out_p, K*C_in); bias (C_out_p, 1) f32.
    w2 = jnp.transpose(weight, (0, 2, 1)).reshape(C_out, KC).astype(cdt)
    b2 = jnp.zeros((C_out,), jnp.float32) if bias is None else bias.astype(jnp.float32)
    if C_out_p != C_out:
        w2 = jnp.pad(w2, ((0, C_out_p - C_out), (0, 0)))
        b2 = jnp.pad(b2, ((0, C_out_p - C_out),))
    b2 = b2.reshape(C_out_p, 1)

    est = fixed + per_col * TL
    vmem_limit = int(min(56 * 2 ** 20, max(32 * 2 ** 20, 2 * est)))

    kernel = functools.partial(_conv1d_kernel, K=K, C_in=C_in, stride=stride,
                               dilation=dilation, TL=TL, q_max=q_max)
    out = pl.pallas_call(
        kernel,
        out_shape=jax.ShapeDtypeStruct((N, C_out_p, L_out_p), out_dtype),
        grid=(N, n_co, n_lt),
        in_specs=[
            pl.BlockSpec((1, SC, TL), lambda n, co, j: (n, 0, j)),       # main tile
            pl.BlockSpec((1, 1, SC, H), lambda n, co, j: (n, j, 0, 0)),  # halo
            pl.BlockSpec((TCO, KC), lambda n, co, j: (co, 0)),           # weight
            pl.BlockSpec((TCO, 1), lambda n, co, j: (co, 0)),            # bias
        ],
        out_specs=pl.BlockSpec((1, TCO, TL), lambda n, co, j: (n, co, j)),
        scratch_shapes=[pltpu.VMEM((KC, TL), cdt)],
        compiler_params=pltpu.CompilerParams(
            dimension_semantics=("parallel", "parallel", "parallel"),
            vmem_limit_bytes=vmem_limit),
    )(x_flat, halo, w2, b2)

    if C_out_p != C_out or L_out_p != L_out:
        out = out[:, :C_out, :L_out]
    return out


# ----------------------------- reference & tests -----------------------------

def _ref_conv1d(x, weight, bias, stride, padding, dilation, groups):
    ref = lax.conv_general_dilated(
        x, weight, window_strides=(stride,), padding=[(padding, padding)],
        rhs_dilation=(dilation,), dimension_numbers=("NCH", "OIH", "NCH"),
        feature_group_count=groups)
    if bias is not None:
        ref = ref + bias[None, :, None]
    return ref


def _run_case(key, N, C_in, C_out, K, stride, padding, dilation, L,
              use_bias=True, compute_dtype=jnp.bfloat16, tol=1e-2):
    kx, kw, kb = jax.random.split(key, 3)
    fan_in = C_in * K
    bound = 1.0 / (fan_in ** 0.5)
    weight = jax.random.uniform(kw, (C_out, C_in, K), jnp.float32, -bound, bound)
    bias = jax.random.uniform(kb, (C_out,), jnp.float32, -bound, bound) if use_bias else None
    x = jax.random.normal(kx, (N, C_in, L), jnp.float32)

    out = conv1d_layer_forward(x, weight, bias, stride=stride, padding=padding,
                               dilation=dilation, groups=1,
                               compute_dtype=compute_dtype)
    out = jax.block_until_ready(out)

    # Reference: when computing in bf16, compare against the same bf16-rounded
    # operands (products are exact in f32, so only accumulation order differs).
    if jnp.dtype(compute_dtype) == jnp.dtype(jnp.bfloat16):
        xr = x.astype(jnp.bfloat16).astype(jnp.float32)
        wr = weight.astype(jnp.bfloat16).astype(jnp.float32)
    else:
        xr, wr = x, weight
    ref = _ref_conv1d(xr, wr, bias, stride, padding, dilation, 1)
    assert out.shape == ref.shape, (out.shape, ref.shape)
    err = float(jnp.max(jnp.abs(out.astype(jnp.float32) - ref)))
    assert err < tol, (err, tol)


if __name__ == "__main__":
    key = jax.random.PRNGKey(0)
    k1, k2, k3 = jax.random.split(key, 3)
    # Small config matching the module hyperparameters; exact-math f32 check.
    _run_case(k1, N=2, C_in=4, C_out=8, K=3, stride=1, padding=1, dilation=1, L=16,
              compute_dtype=jnp.float32, tol=1e-3)
    # Same config on the default bf16 path.
    _run_case(k1, N=2, C_in=4, C_out=8, K=3, stride=1, padding=1, dilation=1, L=16,
              compute_dtype=jnp.bfloat16, tol=1e-2)
    # Strided + dilated + odd channel counts (exercises phase decomposition).
    _run_case(k2, N=1, C_in=3, C_out=5, K=5, stride=2, padding=2, dilation=2, L=37,
              compute_dtype=jnp.bfloat16, tol=1e-2)
    # Longer sequence (multi-tile L path with halo, forced 2-step grid).
    _run_case(k3, N=1, C_in=4, C_out=8, K=3, stride=1, padding=1, dilation=1, L=2300,
              compute_dtype=jnp.bfloat16, tol=1e-2)
    print("KERNEL_OK")
</pallas_src>

<mosaic_0001>
module attributes {stable_mosaic.version = 11 : i64} {
  func.func @_conv1d_kernel(%arg0: i32, %arg1: i32, %arg2: i32, %arg3: memref<1x4x128xf32, #tpu.memory_space<vmem>>, %arg4: memref<1x1x4x2xf32, #tpu.memory_space<vmem>>, %arg5: memref<8x12xf32, #tpu.memory_space<vmem>>, %arg6: memref<8x1xf32, #tpu.memory_space<vmem>>, %arg7: memref<1x8x128xf32, #tpu.memory_space<vmem>>, %arg8: memref<12x128xf32, #tpu.memory_space<vmem>>) attributes {dimension_semantics = [#tpu.dimension_semantics<parallel>, #tpu.dimension_semantics<parallel>, #tpu.dimension_semantics<parallel>], iteration_bounds = array<i64: 2, 1, 1>, scalar_prefetch = 0 : i64, scratch_operands = 1 : i64, tpu.core_type = #tpu.core_type<tc>, window_params = [{transform_indices = @transform_0, window_bounds = array<i64: 1, 4, 128>}, {transform_indices = @transform_1, window_bounds = array<i64: 1, 1, 4, 2>}, {transform_indices = @transform_2, window_bounds = array<i64: 8, 12>}, {transform_indices = @transform_3, window_bounds = array<i64: 8, 1>}, {transform_indices = @transform_4, window_bounds = array<i64: 1, 8, 128>}]} {
    %c0 = arith.constant 0 : index
    %c0_0 = arith.constant 0 : index
    %c0_1 = arith.constant 0 : index
    %0 = vector.load %arg3[%c0, %c0_0, %c0_1] : memref<1x4x128xf32, #tpu.memory_space<vmem>>, vector<1x4x128xf32>
    %1 = vector.shape_cast %0 : vector<1x4x128xf32> to vector<4x128xf32>
    %c0_2 = arith.constant 0 : index
    %c0_3 = arith.constant 0 : index
    %2 = vector.load %arg8[%c0_2, %c0_3] : memref<12x128xf32, #tpu.memory_space<vmem>>, vector<4x128xf32>
    tpu.vector_store %arg8[%c0_2, %c0_3], %1 {strides = array<i32>} : memref<12x128xf32, #tpu.memory_space<vmem>>, vector<4x128xf32>,
    %c0_4 = arith.constant 0 : index
    %c0_5 = arith.constant 0 : index
    %c1 = arith.constant 1 : index
    %3 = vector.load %arg3[%c0_4, %c0_5, %c1] : memref<1x4x128xf32, #tpu.memory_space<vmem>>, vector<1x4x127xf32>
    %4 = vector.shape_cast %3 : vector<1x4x127xf32> to vector<4x127xf32>
    %c4 = arith.constant 4 : index
    %c0_6 = arith.constant 0 : index
    %5 = vector.load %arg8[%c4, %c0_6] : memref<12x128xf32, #tpu.memory_space<vmem>>, vector<4x127xf32>
    tpu.vector_store %arg8[%c4, %c0_6], %4 {strides = array<i32>} : memref<12x128xf32, #tpu.memory_space<vmem>>, vector<4x127xf32>,
    %c0_7 = arith.constant 0 : index
    %c0_8 = arith.constant 0 : index
    %c0_9 = arith.constant 0 : index
    %c0_10 = arith.constant 0 : index
    %6 = vector.load %arg4[%c0_7, %c0_8, %c0_9, %c0_10] : memref<1x1x4x2xf32, #tpu.memory_space<vmem>>, vector<1x1x4x1xf32>
    %7 = vector.shape_cast %6 : vector<1x1x4x1xf32> to vector<4x1xf32>
    %c4_11 = arith.constant 4 : index
    %c127 = arith.constant 127 : index
    %8 = vector.load %arg8[%c4_11, %c127] : memref<12x128xf32, #tpu.memory_space<vmem>>, vector<4x1xf32>
    tpu.vector_store %arg8[%c4_11, %c127], %7 {strides = array<i32>} : memref<12x128xf32, #tpu.memory_space<vmem>>, vector<4x1xf32>,
    %c0_12 = arith.constant 0 : index
    %c0_13 = arith.constant 0 : index
    %c2 = arith.constant 2 : index
    %9 = vector.load %arg3[%c0_12, %c0_13, %c2] : memref<1x4x128xf32, #tpu.memory_space<vmem>>, vector<1x4x126xf32>
    %10 = vector.shape_cast %9 : vector<1x4x126xf32> to vector<4x126xf32>
    %c8 = arith.constant 8 : index
    %c0_14 = arith.constant 0 : index
    %11 = vector.load %arg8[%c8, %c0_14] : memref<12x128xf32, #tpu.memory_space<vmem>>, vector<4x126xf32>
    tpu.vector_store %arg8[%c8, %c0_14], %10 {strides = array<i32>} : memref<12x128xf32, #tpu.memory_space<vmem>>, vector<4x126xf32>,
    %c0_15 = arith.constant 0 : index
    %c0_16 = arith.constant 0 : index
    %c0_17 = arith.constant 0 : index
    %c0_18 = arith.constant 0 : index
    %12 = vector.load %arg4[%c0_15, %c0_16, %c0_17, %c0_18] : memref<1x1x4x2xf32, #tpu.memory_space<vmem>>, vector<1x1x4x2xf32>
    %13 = vector.shape_cast %12 : vector<1x1x4x2xf32> to vector<4x2xf32>
    %c8_19 = arith.constant 8 : index
    %c126 = arith.constant 126 : index
    %14 = vector.load %arg8[%c8_19, %c126] : memref<12x128xf32, #tpu.memory_space<vmem>>, vector<4x2xf32>
    tpu.vector_store %arg8[%c8_19, %c126], %13 {strides = array<i32>} : memref<12x128xf32, #tpu.memory_space<vmem>>, vector<4x2xf32>,
    %c0_20 = arith.constant 0 : index
    %c0_21 = arith.constant 0 : index
    %15 = vector.load %arg8[%c0_20, %c0_21] : memref<12x128xf32, #tpu.memory_space<vmem>>, vector<12x128xf32>
    %c0_22 = arith.constant 0 : index
    %c0_23 = arith.constant 0 : index
    %16 = vector.load %arg5[%c0_22, %c0_23] : memref<8x12xf32, #tpu.memory_space<vmem>>, vector<8x12xf32>
    %cst = arith.constant dense<0.000000e+00> : vector<8x128xf32>
    %17 = tpu.matmul %16, %15, %cst {dimension_numbers = #tpu.dot_dimension_numbers<[1], [0], [0], [1], [0, 0, 1, 1], [], []>} : vector<8x12xf32>, vector<12x128xf32>, vector<8x128xf32> -> vector<8x128xf32>
    %c0_24 = arith.constant 0 : index
    %c0_25 = arith.constant 0 : index
    %18 = vector.load %arg6[%c0_24, %c0_25] : memref<8x1xf32, #tpu.memory_space<vmem>>, vector<8x1xf32>
    %19 = vector.broadcast %18 : vector<8x1xf32> to vector<8x128xf32>
    %20 = arith.addf %17, %19 : vector<8x128xf32>
    %c0_26 = arith.constant 0 : index
    %c0_27 = arith.constant 0 : index
    %c0_28 = arith.constant 0 : index
    %21 = vector.load %arg7[%c0_26, %c0_27, %c0_28] : memref<1x8x128xf32, #tpu.memory_space<vmem>>, vector<1x8x128xf32>
    %22 = vector.shape_cast %21 : vector<1x8x128xf32> to vector<8x128xf32>
    %23 = vector.shape_cast %20 : vector<8x128xf32> to vector<1x8x128xf32>
    tpu.vector_store %arg7[%c0_26, %c0_27, %c0_28], %23 {strides = array<i32>} : memref<1x8x128xf32, #tpu.memory_space<vmem>>, vector<1x8x128xf32>,
    return
  }
  func.func @transform_0(%arg0: i32, %arg1: i32, %arg2: i32) -> (i32, i32, i32) {
    %c0_i32 = arith.constant 0 : i32
    %c0_i32_0 = arith.constant 0 : i32
    return %arg0, %c0_i32, %arg2 : i32, i32, i32
  }
  func.func @transform_1(%arg0: i32, %arg1: i32, %arg2: i32) -> (i32, i32, i32, i32) {
    %c0_i32 = arith.constant 0 : i32
    %c0_i32_0 = arith.constant 0 : i32
    %c0_i32_1 = arith.constant 0 : i32
    return %arg0, %arg2, %c0_i32, %c0_i32_0 : i32, i32, i32, i32
  }
  func.func @transform_2(%arg0: i32, %arg1: i32, %arg2: i32) -> (i32, i32) {
    %c0_i32 = arith.constant 0 : i32
    %c0_i32_0 = arith.constant 0 : i32
    return %arg1, %c0_i32 : i32, i32
  }
  func.func @transform_3(%arg0: i32, %arg1: i32, %arg2: i32) -> (i32, i32) {
    %c0_i32 = arith.constant 0 : i32
    %c0_i32_0 = arith.constant 0 : i32
    return %arg1, %c0_i32 : i32, i32
  }
  func.func @transform_4(%arg0: i32, %arg1: i32, %arg2: i32) -> (i32, i32, i32) {
    %c0_i32 = arith.constant 0 : i32
    return %arg0, %arg1, %arg2 : i32, i32, i32
  }
}

</mosaic_0001>

<bundles_post_ra>
// kernel: conv1d_layer_forward.1
= control target key start
LH: loop header
LB: loop body
LE: loop exit
PB: predicated region body
PF: predicated region fallthrough
CT: control target
= control target key end

     0   :  { %9 = vsyncpa [#allocation4], 0  ;;  %s878_s0 = inlined_call_operand.vmem [shape: f32[2,4,130], index: 0, kind: input, shape index: {}]   ;;  %s879_s1 = inlined_call_operand.vmem [shape: f32[2,1,4,2], index: 1, kind: input, shape index: {}]   ;;  %s880_s2 = inlined_call_operand.vmem [shape: f32[8,12], index: 2, kind: input, shape index: {}]   ;;  %s881_s3 = inlined_call_operand.vmem [shape: f32[8,1], index: 3, kind: input, shape index: {}]   ;;  %s882_s4 = inlined_call_operand.hbm [shape: f32[2,8,128], index: 4, kind: output, shape index: {}]  }
   0x1   :  { %11 = vsyncpa [#allocation4 + $0x1], 0  ;;  %s757_s15 = smov 0   ;;  %s759_s16 = smov 0  }
   0x2   :  { %s761_s17 = smov 0   ;;  %s763_s18 = smov 0  }
   0x3   :  { %s765_s19 = smov 0   ;;  %s767_s20 = smov 0  }
   0x4 LB: > { %s549_s21 = sadd.s32 4294967295, %s722_s20   ;;  %s550_s22 = sadd.s32 4294967294, %s722_s20   ;;  %s722_s20 = sphi %s767_s20, %s17_s20   ;;  %s718_s19 = sphi %s765_s19, %s889_s19   ;;  %s714_s18 = sphi %s763_s18, %s888_s18   ;;  %s710_s17 = sphi %s761_s17, %s887_s17   ;;  %s706_s16 = sphi %s759_s16, %s886_s16   ;;  %s702_s15 = sphi %s757_s15, %s885_s15  }
   0x5   : > { %s36_s23 = sadd.s32 1, %s718_s19  ;;  %s155_s24 = sadd.s32 1, %s710_s17 }
   0x6   : > { %p38_p0 = scmp.ge.s32.totalorder %s36_s23, 2  ;;  %p165_p1 = scmp.ne.s32.totalorder %s710_s17, %s706_s16 }
   0x7   : > { %p166_p2 = scmp.eq.s32.totalorder %s549_s21, 1  ;;  %p171_p3 = scmp.ne.s32.totalorder %s706_s16, %s702_s15 }
   0x8   : > { %s891_s23 = smov (%p38_p0, %s36_s23), 0  ;;  %p172_p5 = scmp.eq.s32.totalorder %s550_s22, 1 }
   0x9   : > { %p797_p4 = por %p166_p2, %p165_p1  ;;  %s148_s26 = ssub.s32 %s718_s19, %s891_s23 }
   0xa   : > { %p555_p6 = scmp.ge.s32.totalorder %s722_s20, 1  ;;  %p153_p7 = scmp.eq.s32.totalorder %s148_s26, 0 }
   0xb   : > { %p804_p8 = por %p172_p5, %p171_p3  ;;  %p225_p9 = scmp.lt.s32.totalorder %s722_s20, 3 }
   0xc   : > { %s810_s28 = scalar_select %p153_p7, %s710_s17, %s155_s24  }
   0xd   : > { %p226_p10 = pnand %p555_p6, %p225_p9 }
   0xe   : > { %p269_p11 = scmp.lt.s32.totalorder (!%p226_p10), %s714_s18, 1  ;;  %v724_v0 = vmov (!%p226_p10), 0.0|0.0   ;;  %s725_s12 = smov (!%p226_p10), 127   ;;  %vm726_vm0 = vmmov (!%p226_p10), 0   ;;  %v727_v6 = vmov (!%p226_p10), 0.0   ;;  %v325_v7 = vld [vmem:[%s881_s3] sm:$0xff] (!%p226_p10) }
   0xf   : > { %229 = sbr.rel (%p226_p10) target bundleno = 389 (0x185), region = 36  ;;  %577 = vmatprep.subr.bf16.mxu0 (!%p226_p10), %v724_v0  ;;  %574 = vmatprep.mubr.msk.f32.mxu0 (!%p226_p10), %vm726_vm0, %v727_v6  ;;  %s728_s13 = smov (!%p226_p10), 126   ;;  %v729_v8 = vmov (!%p226_p10), 0   ;;  %vm299_vm1 = vcmask (!%p226_p10), 1035264   ;;  %vm306_vm2 = vcmask (!%p226_p10), 1044472   ;;  %vm313_vm3 = vcmask (!%p226_p10), 1027072  }
  0x10   : > { %643 = vset.pattern.permute.xlu0 (!%p226_p10), %v729_v8  ;;  %vm320_vm4 = vcmask (!%p226_p10), 1044464   ;;  %vm335_vm5 = vcmask (!%p226_p10), 1043456   ;;  %vm730_vm6 = vmmov (!%p226_p10), 1   ;;  %v324_v16 = vld [vmem:[%s880_s2] sm:$0xff] (!%p226_p10)  ;;  %vm331_vm8 = vcmask (!%p226_p10), 97280   ;;  %s266_s26 = sand.u32 (!%p226_p10), 1, %s706_s16  }
  0x11   : > { %vm579_vm7 = vmpackc.low (!%p226_p10), %vm335_vm5, %vm730_vm6  ;;  %s411_s10 = scalar_lea.sflag (!%p226_p10), [#allocation4], %s266_s26 }
  0x16   : > { %s270_s29 = scalar_select %p269_p11, %s714_s18, 1 }
  0x18   : > { %s566_s30 = sshll.u32 %s270_s29, 3  ;;  %s559_s5 = sshll.u32 %s270_s29, 2 }
  0x19   : > { %s276_s8 = scalar_lea.vmem %s878_s0, %s566_s30  ;;  %s283_s11 = scalar_lea.vmem %s879_s1, %s559_s5 }
  0x1a   : > { %v294_v1 = vld [vmem:[%s276_s8] sm:$0xf]  ;;  %s556_s29 = sshll.u32 %s266_s26, 3  ;;  %s563_s30 = sshll.u32 %s714_s18, 7 }
  0x1b   : > { %v292_v2 = vld [vmem:[%s276_s8] sm:$0xf]  ;;  %296 = vrot.lane.b32.xlu0 %v294_v1, %s725_s12  ;;  %s268_s5 = scalar_lea.vmem [#allocation3], %s556_s29  ;;  %s831_s9 = scalar_lea.hbm %s882_s4, %s563_s30 }
  0x1c   : > { %v301_v3 = vld [vmem:[%s283_s11] sm:$0xf]  ;;  %293 = vst [vmem:[#allocation2] sm:$0xf] %v292_v2  ;;  %s426_s6 = sshll.u32 %s268_s5, 4  ;;  %s731_s18 = smov [#allocation3]   ;;  %s833_s6 = int_to_ptr.vmem [resolvable:$true] %s426_s6 }
  0x1d   : > { %303 = vrot.lane.b32.xlu1 %v301_v3, %s725_s12  ;;  %v308_v4 = vld [vmem:[%s276_s8] sm:$0xf]  ;;  %s648_s12 = sshll.u32 %s731_s18, 4  ;;  %s649_s12 = int_to_ptr.vmem [resolvable:$false] %s648_s12 }
  0x1e   : > { %v315_v5 = vld [vmem:[%s283_s11] sm:$0xf]  ;;  %s644_s11 = scalar_lea.vmem %s833_s6, 128  ;;  %p651_p1 = scmp.lt.s32.totalorder %s833_s6, %s649_s12 }
  0x1f   : > { %310 = vrot.lane.b32.xlu0 %v308_v4, %s728_s13  ;;  %p645_p12 = scmp.ne.s32.totalorder %s833_s6, %s644_s11 }
  0x21   : > { %317 = vrot.lane.b32.xlu1 %v315_v5, %s728_s13  ;;  %p646_p13 = pnand %p645_p12, %p797_p4  ;;  %s650_s13 = scalar_lea.vmem %s649_s12, 256 }
  0x22   : > { %p652_p2 = scmp.lt.s32.totalorder %s650_s13, %s644_s11 }
  0x23   : > { %328 = vperm.xlu0 %643, %v325_v7   ;;  %p647_p0 = pneg %p646_p13 }
  0x24   : > { %p653_p3 = por %p652_p2, %p651_p1 }
  0x26   : > { %p654_p5 = pnand %p653_p3, %p647_p0 }
  0x8d   : > { %v297_v9 = vpop.permute.xlu0 %296 }
  0x8e   : > { %300 = vst.msk [vmem:[#allocation2 + $0x4] sm:$0xf] %vm299_vm1, %v297_v9 }
  0x8f   : > { %v304_v10 = vpop.permute.xlu1 %303 }
  0x90   : > { %307 = vst.msk [vmem:[#allocation2 + $0x4] sm:$0xf] %vm306_vm2, %v304_v10 }
  0x91   : > { %v311_v11 = vpop.permute.xlu0 %310 }
  0x92   : > { %314 = vst.msk [vmem:[#allocation2 + $0x8] sm:$0xf] %vm313_vm3, %v311_v11 }
  0x93   : > { %v318_v12 = vpop.permute.xlu1 %317 }
  0x94   : > { %321 = vst.msk [vmem:[#allocation2 + $0x8] sm:$0xf] %vm320_vm4, %v318_v12 }
  0x97   : > { %v322_v13 = vld [vmem:[#allocation2] sm:$0xff] }
  0x9b   : > { %v323_v14 = vld [vmem:[#allocation2 + $0x8] sm:$0xf] }
  0x9c   : > { %v578_v15 = vpack.c.bf16 %v323_v14, %v322_v13 }
  0x9e   : > { %580 = vmatpush3.bf16.msk.msra.mxu0 %vm579_vm7, %v578_v15 }
  0xa1   : > { %575 = vmatmul.mubr.msk.f32.vlgmr.msra.gmra.mrb[0].mxu0 %vm331_vm8, %v324_v16 }
  0xa2   : > { %v329_v17 = vpop.permute.xlu0 %328 }
 0x174   : > { %v405_v18 = vpop.f32.mrb[0].mxu0 }
 0x175   : > { %v406_v19 = vadd.f32 %v405_v18, %v329_v17  ;;  %v576_v20 = vpop.f32.mrb[1].mxu0 }
 0x177   : > { %409 = vst [vmem:[%s268_s5] sm:$0xff] %v406_v19 }
 0x178   : > { %657 = shalt.err (!%p654_p5)
}
 0x179   : > { %s658_s14 = scalar_lea.hbm %s831_s9, 128  ;;  %s662_s24 = scalar_lea.hbm %s882_s4, 256 }
 0x17a   : > { %p659_p6 = scmp.ne.s32.totalorder %s831_s9, %s658_s14  ;;  %p663_p10 = scmp.lt.u32.totalorder %s831_s9, %s882_s4 }
 0x17b   : > { %p664_p11 = scmp.lt.u32.totalorder %s662_s24, %s658_s14  ;;  %p666_p13 = scmp.lt.u32.totalorder %s658_s14, %s831_s9 }
 0x17c   : > { %p660_p7 = pnand %p659_p6, %p797_p4 }
 0x17d   : > { %p665_p12 = por %p664_p11, %p663_p10 }
 0x17e   : > { %p661_p9 = pneg %p660_p7 }
 0x17f   : > { %p667_p0 = por %p666_p13, %p665_p12 }
 0x181   : > { %p668_p1 = pnand %p667_p0, %p661_p9 }
 0x183   : > { %671 = shalt.err (!%p668_p1)
}
 0x184   : > { %581 = dma.vmem_to_hbm [thread:$0]  (%p797_p4), %s833_s6, 128, %s831_s9, %s411_s10  }
 0x185 PF: > { %p587_p2 = scmp.ge.s32.totalorder %s722_s20, 2  ;;  %s438_s30 = sand.u32 1, %s702_s15  }
 0x186   : > { %s439_s5 = scalar_lea.sflag [#allocation4], %s438_s30 }
 0x187   : > { %p584_p3 = pnand %p587_p2, %p804_p8 }
 0x189   : > { %697 = dma.done.wait (!%p584_p3), %s439_s5, 128  }
 0x18a   : > { %699 = vsyncadd (!%p584_p3), %s439_s5, 4294967168  ;;  %s17_s20 = sadd.s32 1, %s722_s20   ;;  %s885_s15 = smov %s706_s16 }
 0x18b   : > { %p14_p5 = scmp.ge.s32.totalorder %s17_s20, 4   ;;  %s886_s16 = smov %s710_s17 }
 0x18c   : > { %s887_s17 = smov %s810_s28  ;;  %s888_s18 = smov %s718_s19 }
 0x18d   : > { %s889_s19 = smov %s891_s23  ;;  %16 = sbr.rel (!%p14_p5) target bundleno = 4 (0x4), region = 80 }
 0x194   :  { %444 = vsyncpa [#allocation4], 1 }
 0x195   :  { %446 = vsyncpa [#allocation4 + $0x1], 1 }

</bundles_post_ra>
